<compile_context>
chip_gen: v6e
topology: v6e:2x2x1
jax: 0.10.0
libtpu: 0.0.40
codegen_flags: <defaults>
</compile_context>

<pallas_src>
import functools
import math

import jax
import jax.numpy as jnp
from jax.experimental import pallas as pl
from jax.experimental.pallas import tpu as pltpu


def _round_up(x, m):
    return (x + m - 1) // m * m


# ----------------------------- Pallas kernel -----------------------------

def _layernorm_t(x, gamma, beta, eps=1e-5):
    # nn.LayerNorm (biased variance, eps=1e-5) over the feature axis, which is
    # axis 0 (sublanes) in the transposed token-on-lane layout.  Kept in f32.
    mean = jnp.mean(x, axis=0, keepdims=True)                  # (1, TM)
    var = jnp.mean(jnp.square(x - mean), axis=0, keepdims=True)
    inv = jax.lax.rsqrt(var + eps)
    return (x - mean) * inv * gamma + beta                     # gamma/beta: (nf, 1)


def encoder_stack_kernel(num_head, head_feature, num_feature,
                         x_ref,       # (nf, TM) f32    input token tile
                         wqkv_ref,    # (L, 3nf, nf) bf16  VMEM-resident
                         wfc_ref,     # (L, nf, nf)  bf16  VMEM-resident
                         vec_ref,     # (L, 9nf, 1)  f32   VMEM-resident
                         o_ref):      # (nf, TM) f32    carried activations
    H, hf, nf = num_head, head_feature, num_feature
    l = pl.program_id(1)

    # Layer 0: seed the resident output block with the input tile.  For l > 0
    # the o_ref block index is unchanged, so it stays in VMEM and carries the
    # activations across the layer axis (no HBM round trip between layers).
    @pl.when(l == 0)
    def _():
        o_ref[...] = x_ref[...]

    x = o_ref[...]                                             # (nf, TM) f32

    # Per-layer parameters (weights resident in VMEM; index by layer id).
    wqkv = wqkv_ref[l]                                         # (3nf, nf) bf16
    wfc = wfc_ref[l]                                           # (nf, nf)  bf16
    vec = vec_ref[l]                                           # (9nf, 1)  f32
    bqkv = vec[0 * nf:3 * nf, :]
    bfc2 = vec[3 * nf:4 * nf, :]
    g1 = vec[4 * nf:5 * nf, :]
    b1 = vec[5 * nf:6 * nf, :]
    bfc = vec[6 * nf:7 * nf, :]
    g2 = vec[7 * nf:8 * nf, :]
    b2 = vec[8 * nf:9 * nf, :]

    # Fused Q|K|V' projection (blockdiag(fc2) already folded into the V block
    # at pack time).  bf16 operands, f32 accumulation.
    qkv = jnp.dot(wqkv, x.astype(jnp.bfloat16),
                  preferred_element_type=jnp.float32) + bqkv   # (3nf, TM) f32

    # Sublane-tile-aligned (hf, TM) head slices (hf == 8 == sublane count).
    q = [qkv[h * hf:(h + 1) * hf, :] for h in range(H)]
    k = [qkv[nf + g * hf:nf + (g + 1) * hf, :] for g in range(H)]
    v = [qkv[2 * nf + g * hf:2 * nf + (g + 1) * hf, :] for g in range(H)]

    # Reference MHA semantics: per-token (H, H) head-vs-head attention, NO
    # 1/sqrt(d) scaling (matches the PyTorch reshape/matmul exactly).
    # Streamed per (h, g) pair so every temporary is only (hf, TM): no spills.
    att_blocks = []
    for h in range(H):                        # static unrolled loops (H = 4)
        s = [jnp.sum(q[h] * k[g], axis=0, keepdims=True)       # (1, TM)
             for g in range(H)]
        m = s[0]
        for g in range(1, H):
            m = jnp.maximum(m, s[g])                            # f32 max-subtract
        e = [jnp.exp(s[g] - m) for g in range(H)]
        denom = e[0]
        for g in range(1, H):
            denom = denom + e[g]
        inv = 1.0 / denom                                       # exact divide
        acc = (e[0] * inv) * v[0]                               # (hf, TM)
        for g in range(1, H):
            acc = acc + (e[g] * inv) * v[g]
        att_blocks.append(acc)
    att = jnp.concatenate(att_blocks, axis=0) + bfc2            # (nf, TM)

    # residual + LayerNorm1
    y = _layernorm_t(att + x, g1, b1)
    # fc + residual + LayerNorm2
    z = jnp.dot(wfc, y.astype(jnp.bfloat16),
                preferred_element_type=jnp.float32) + bfc
    o_ref[...] = _layernorm_t(z + y, g2, b2)


def encoder_stack(x_t, packed_params, num_head, *, max_tile_m=1024):
    """Run the full encoder-layer stack in one pallas_call.

    x_t: (nf, M) float32, token-on-lane layout.
    packed_params: (wqkv (L,3nf,nf) bf16, wfc (L,nf,nf) bf16, vec (L,9nf,1) f32).
    """
    nf, M = x_t.shape
    hf = nf // num_head
    wqkv, wfc, vec = packed_params
    num_layers = wqkv.shape[0]

    # Token-tile size: multiple of 128 (lane-dense), capped both by
    # max_tile_m and by ~half the token count so there are >=2 tiles whenever
    # possible (keeps both v7x TensorCores busy on the "parallel" axis).
    half = -(-max(M, 1) // 2)
    tile_m = min(max_tile_m, _round_up(half, 128))
    m_pad = _round_up(max(M, 1), tile_m)
    if m_pad != M:
        x_t = jnp.pad(x_t, ((0, 0), (0, m_pad - M)))
    n_tiles = m_pad // tile_m

    kern = functools.partial(encoder_stack_kernel, num_head, hf, nf)

    # Layer weights: fully VMEM-resident for the whole grid (no per-step DMA,
    # no re-streaming per token tile); indexed with pl.program_id(1) inside.
    resident = pl.BlockSpec(memory_space=pltpu.MemorySpace.VMEM)
    in_specs = [pl.BlockSpec((nf, tile_m), lambda i, l: (0, i)),
                resident, resident, resident]

    weight_bytes = sum(int(p.size) * p.dtype.itemsize for p in packed_params)
    act_bytes = 2 * 2 * nf * tile_m * 4            # double-buffered in+out tiles
    vmem_limit = int(min(48 * 1024 * 1024,
                         max(16 * 1024 * 1024,
                             2 * weight_bytes + 8 * act_bytes + (8 << 20))))

    out = pl.pallas_call(
        kern,
        out_shape=jax.ShapeDtypeStruct((nf, m_pad), jnp.float32),
        grid=(n_tiles, num_layers),
        in_specs=in_specs,
        out_specs=pl.BlockSpec((nf, tile_m), lambda i, l: (0, i)),
        compiler_params=pltpu.CompilerParams(
            dimension_semantics=("parallel", "arbitrary"),
            vmem_limit_bytes=vmem_limit),
    )(x_t, wqkv, wfc, vec)
    return out[:, :M]


# ------------------------- parameter construction -------------------------

def init_linear(key, fan_in, fan_out):
    # nn.Linear-style uniform init; weight stored transposed as (in, out).
    kw, kb = jax.random.split(key)
    bound = 1.0 / math.sqrt(fan_in)
    w = jax.random.uniform(kw, (fan_in, fan_out), jnp.float32, -bound, bound)
    b = jax.random.uniform(kb, (1, fan_out), jnp.float32, -bound, bound)
    return w, b


def init_encoder_layer(key, num_feature, num_head):
    hf = num_feature // num_head
    keys = jax.random.split(key, 5)
    wq, bq = init_linear(keys[0], num_feature, num_feature)
    wk, bk = init_linear(keys[1], num_feature, num_feature)
    wv, bv = init_linear(keys[2], num_feature, num_feature)
    wfc2, bfc2 = init_linear(keys[3], hf, hf)
    wfc, bfc = init_linear(keys[4], num_feature, num_feature)
    g1 = jnp.ones((1, num_feature), jnp.float32)
    b1 = jnp.zeros((1, num_feature), jnp.float32)
    g2 = jnp.ones((1, num_feature), jnp.float32)
    b2 = jnp.zeros((1, num_feature), jnp.float32)
    return (wq, bq, wk, bk, wv, bv, wfc2, bfc2, g1, b1, wfc, bfc, g2, b2)


def pack_layer_params(layer_params, num_head):
    """Fuse + transpose + stack per-layer weights for the fused-stack kernel.

    Returns:
      wqkv (L, 3nf, nf) bf16 : [Wq; Wk; blockdiag(Wfc2) @ Wv]  (torch orientation)
      wfc  (L, nf, nf)  bf16 : Wfc (torch orientation)
      vec  (L, 9nf, 1)  f32  : [bq; bk; blockdiag(Wfc2)@bv; bfc2 tiled;
                                gamma1; beta1; bfc; gamma2; beta2]
    """
    H = num_head
    wqkv_l, wfc_l, vec_l = [], [], []
    for (wq, bq, wk, bk, wv, bv, wfc2, bfc2, g1, b1, wfc, bfc, g2, b2) in layer_params:
        eye = jnp.eye(H, dtype=jnp.float32)
        bd = jnp.kron(eye, wfc2.T)                              # (nf, nf) block-diag
        wv_fold = bd @ wv.T                                     # fold fc2 into V proj
        bv_fold = bd @ bv.T                                     # (nf, 1)
        wqkv = jnp.concatenate([wq.T, wk.T, wv_fold], axis=0)   # (3nf, nf)
        bqkv = jnp.concatenate([bq.T, bk.T, bv_fold], axis=0)   # (3nf, 1)
        bfc2_t = jnp.tile(bfc2, (1, H)).T                       # (nf, 1)
        vec = jnp.concatenate(
            [bqkv, bfc2_t, g1.T, b1.T, bfc.T, g2.T, b2.T], axis=0)  # (9nf, 1)
        wqkv_l.append(wqkv.astype(jnp.bfloat16))
        wfc_l.append(wfc.T.astype(jnp.bfloat16))
        vec_l.append(vec.astype(jnp.float32))
    return (jnp.stack(wqkv_l, axis=0),
            jnp.stack(wfc_l, axis=0),
            jnp.stack(vec_l, axis=0))


def make_positional_encoding(d_model, max_len=512):
    position = jnp.arange(max_len, dtype=jnp.float32)[:, None]
    div_term = jnp.exp(jnp.arange(0, d_model, 2, dtype=jnp.float32)
                       * (-math.log(10000.0) / d_model))
    pe = jnp.zeros((max_len, d_model), jnp.float32)
    pe = pe.at[:, 0::2].set(jnp.sin(position * div_term))
    pe = pe.at[:, 1::2].set(jnp.cos(position * div_term))
    return pe                                                    # (max_len, d_model)


# ------------------------------ full forward ------------------------------

def trans_encoder_forward(texts, emb_w_t, pe_t, packed_params, num_head):
    """texts: (bs, sl) int32.  emb_w_t: (nf, vocab).  pe_t: (nf, max_len)."""
    bs, sl = texts.shape
    nf = emb_w_t.shape[0]
    # Build x^T directly in (nf, M) token-on-lane layout: gather from the
    # pre-transposed embedding table and add pe^T (no reshape+transpose round
    # trip through HBM).  nn.Dropout is identity at inference.
    tok = texts.reshape(-1)                                      # m = b*sl + s
    x_t = jnp.take(emb_w_t, tok, axis=1).astype(jnp.float32)     # (nf, M)
    x_t = x_t + jnp.tile(pe_t[:, :sl], (1, bs))
    out_t = encoder_stack(x_t, packed_params, num_head)
    return out_t.T.reshape(bs, sl, nf)


# --------------------------- pure-JAX reference ---------------------------

def _ref_layernorm(x, g, b, eps=1e-5):
    m = jnp.mean(x, axis=-1, keepdims=True)
    v = jnp.mean(jnp.square(x - m), axis=-1, keepdims=True)
    return (x - m) * jax.lax.rsqrt(v + eps) * g + b


def ref_forward(texts, emb_w, pe, layer_params, num_head):
    bs, sl = texts.shape
    x = jnp.take(emb_w, texts, axis=0) + pe[None, :sl, :]
    for (wq, bq, wk, bk, wv, bv, wfc2, bfc2, g1, b1, wfc, bfc, g2, b2) in layer_params:
        nf = x.shape[-1]
        H = num_head
        hf = nf // H
        Q = (x @ wq + bq).reshape(bs, sl, H, hf)
        K = (x @ wk + bk).reshape(bs, sl, H, hf)
        V = (x @ wv + bv).reshape(bs, sl, H, hf)
        score = jnp.einsum('bshd,bsgd->bshg', Q, K)
        w = jax.nn.softmax(score, axis=-1)
        att = jnp.einsum('bshg,bsgd->bshd', w, V)
        att = (att @ wfc2 + bfc2).reshape(bs, sl, nf)
        x1 = _ref_layernorm(att + x, g1, b1)
        x = _ref_layernorm((x1 @ wfc + bfc) + x1, g2, b2)
    return x


if __name__ == "__main__":
    # small config consistent with the module
    vocab_size = 50
    N = 2
    num_feature = 32
    num_head = 4
    bs, sl = 2, 8

    root = jax.random.PRNGKey(0)
    k_emb, k_tok, k_layers = jax.random.split(root, 3)

    # TODO(synk): the reference loads GoogleNews word2vec into the embedding;
    # here the embedding is the deterministic randn(vocab, nf)*0.25 fallback.
    emb_w = jax.random.normal(k_emb, (vocab_size, num_feature), jnp.float32) * 0.25
    pe = make_positional_encoding(num_feature)
    emb_w_t = emb_w.T                      # (nf, vocab) for lane-dense gather
    pe_t = pe.T                            # (nf, max_len)

    layer_keys = jax.random.split(k_layers, N)
    layer_params = [init_encoder_layer(layer_keys[i], num_feature, num_head)
                    for i in range(N)]
    packed = pack_layer_params(layer_params, num_head)

    texts = jax.random.randint(k_tok, (bs, sl), 0, vocab_size, dtype=jnp.int32)

    out = trans_encoder_forward(texts, emb_w_t, pe_t, packed, num_head)
    out = jax.block_until_ready(out)
    assert out.shape == (bs, sl, num_feature)
    assert bool(jnp.all(jnp.isfinite(out)))

    # correctness vs. pure f32 reference (kernel uses bf16 MXU operands,
    # so allow a loose tolerance)
    ref = jax.block_until_ready(ref_forward(texts, emb_w, pe, layer_params, num_head))
    err = float(jnp.max(jnp.abs(out - ref)))
    assert err < 1e-1, f"max abs error vs reference too large: {err}"

    print("KERNEL_OK")
</pallas_src>

<mosaic_0001>
module attributes {stable_mosaic.version = 11 : i64} {
  func.func @encoder_stack_kernel(%arg0: i32, %arg1: i32, %arg2: memref<32x128xf32, #tpu.memory_space<vmem>>, %arg3: memref<2x96x32xbf16, #tpu.memory_space<vmem>>, %arg4: memref<2x32x32xbf16, #tpu.memory_space<vmem>>, %arg5: memref<2x288x1xf32, #tpu.memory_space<vmem>>, %arg6: memref<32x128xf32, #tpu.memory_space<vmem>>) attributes {dimension_semantics = [#tpu.dimension_semantics<parallel>, #tpu.dimension_semantics<arbitrary>], iteration_bounds = array<i64: 1, 2>, scalar_prefetch = 0 : i64, scratch_operands = 0 : i64, tpu.core_type = #tpu.core_type<tc>, window_params = [{transform_indices = @transform_0, window_bounds = array<i64: 32, 128>}, {pipeline_mode = #tpu.pipeline_mode<synchronous>, transform_indices = @transform_1, window_bounds = array<i64: 2, 96, 32>}, {pipeline_mode = #tpu.pipeline_mode<synchronous>, transform_indices = @transform_2, window_bounds = array<i64: 2, 32, 32>}, {pipeline_mode = #tpu.pipeline_mode<synchronous>, transform_indices = @transform_3, window_bounds = array<i64: 2, 288, 1>}, {transform_indices = @transform_4, window_bounds = array<i64: 32, 128>}]} {
    %c0_i32 = arith.constant 0 : i32
    %0 = arith.cmpi eq, %arg1, %c0_i32 : i32
    %1 = arith.extui %0 : i1 to i32
    %c0_i32_0 = arith.constant 0 : i32
    %2 = arith.cmpi ne, %1, %c0_i32_0 : i32
    scf.if %2 {
      %c0_41 = arith.constant 0 : index
      %c0_42 = arith.constant 0 : index
      %262 = vector.load %arg2[%c0_41, %c0_42] : memref<32x128xf32, #tpu.memory_space<vmem>>, vector<32x128xf32>
      %c0_43 = arith.constant 0 : index
      %c0_44 = arith.constant 0 : index
      %263 = vector.load %arg6[%c0_43, %c0_44] : memref<32x128xf32, #tpu.memory_space<vmem>>, vector<32x128xf32>
      tpu.vector_store %arg6[%c0_43, %c0_44], %262 {strides = array<i32>} : memref<32x128xf32, #tpu.memory_space<vmem>>, vector<32x128xf32>,
    } else {
    }
    %c0 = arith.constant 0 : index
    %c0_1 = arith.constant 0 : index
    %3 = vector.load %arg6[%c0, %c0_1] : memref<32x128xf32, #tpu.memory_space<vmem>>, vector<32x128xf32>
    %4 = arith.index_cast %arg1 : i32 to index
    %c0_2 = arith.constant 0 : index
    %c0_3 = arith.constant 0 : index
    %5 = vector.load %arg3[%4, %c0_2, %c0_3] : memref<2x96x32xbf16, #tpu.memory_space<vmem>>, vector<1x96x32xbf16>
    %6 = vector.shape_cast %5 : vector<1x96x32xbf16> to vector<96x32xbf16>
    %7 = arith.index_cast %arg1 : i32 to index
    %c0_4 = arith.constant 0 : index
    %c0_5 = arith.constant 0 : index
    %8 = vector.load %arg4[%7, %c0_4, %c0_5] : memref<2x32x32xbf16, #tpu.memory_space<vmem>>, vector<1x32x32xbf16>
    %9 = vector.shape_cast %8 : vector<1x32x32xbf16> to vector<32x32xbf16>
    %10 = arith.index_cast %arg1 : i32 to index
    %c0_6 = arith.constant 0 : index
    %c0_7 = arith.constant 0 : index
    %11 = vector.load %arg5[%10, %c0_6, %c0_7] : memref<2x288x1xf32, #tpu.memory_space<vmem>>, vector<1x288x1xf32>
    %12 = vector.shape_cast %11 : vector<1x288x1xf32> to vector<288x1xf32>
    %13 = vector.extract_strided_slice %12 {offsets = [0, 0], sizes = [96, 1], strides = [1, 1]} : vector<288x1xf32> to vector<96x1xf32>
    %14 = vector.extract_strided_slice %12 {offsets = [96, 0], sizes = [32, 1], strides = [1, 1]} : vector<288x1xf32> to vector<32x1xf32>
    %15 = vector.extract_strided_slice %12 {offsets = [128, 0], sizes = [32, 1], strides = [1, 1]} : vector<288x1xf32> to vector<32x1xf32>
    %16 = vector.extract_strided_slice %12 {offsets = [160, 0], sizes = [32, 1], strides = [1, 1]} : vector<288x1xf32> to vector<32x1xf32>
    %17 = vector.extract_strided_slice %12 {offsets = [192, 0], sizes = [32, 1], strides = [1, 1]} : vector<288x1xf32> to vector<32x1xf32>
    %18 = vector.extract_strided_slice %12 {offsets = [224, 0], sizes = [32, 1], strides = [1, 1]} : vector<288x1xf32> to vector<32x1xf32>
    %19 = vector.extract_strided_slice %12 {offsets = [256, 0], sizes = [32, 1], strides = [1, 1]} : vector<288x1xf32> to vector<32x1xf32>
    %20 = arith.truncf %3 : vector<32x128xf32> to vector<32x128xbf16>
    %cst = arith.constant dense<0.000000e+00> : vector<96x128xf32>
    %21 = tpu.matmul %6, %20, %cst {dimension_numbers = #tpu.dot_dimension_numbers<[1], [0], [0], [1], [0, 0, 1, 1], [], []>} : vector<96x32xbf16>, vector<32x128xbf16>, vector<96x128xf32> -> vector<96x128xf32>
    %22 = vector.broadcast %13 : vector<96x1xf32> to vector<96x128xf32>
    %23 = arith.addf %21, %22 : vector<96x128xf32>
    %24 = vector.extract_strided_slice %23 {offsets = [0, 0], sizes = [8, 128], strides = [1, 1]} : vector<96x128xf32> to vector<8x128xf32>
    %25 = vector.extract_strided_slice %23 {offsets = [8, 0], sizes = [8, 128], strides = [1, 1]} : vector<96x128xf32> to vector<8x128xf32>
    %26 = vector.extract_strided_slice %23 {offsets = [16, 0], sizes = [8, 128], strides = [1, 1]} : vector<96x128xf32> to vector<8x128xf32>
    %27 = vector.extract_strided_slice %23 {offsets = [24, 0], sizes = [8, 128], strides = [1, 1]} : vector<96x128xf32> to vector<8x128xf32>
    %28 = vector.extract_strided_slice %23 {offsets = [32, 0], sizes = [8, 128], strides = [1, 1]} : vector<96x128xf32> to vector<8x128xf32>
    %29 = vector.extract_strided_slice %23 {offsets = [40, 0], sizes = [8, 128], strides = [1, 1]} : vector<96x128xf32> to vector<8x128xf32>
    %30 = vector.extract_strided_slice %23 {offsets = [48, 0], sizes = [8, 128], strides = [1, 1]} : vector<96x128xf32> to vector<8x128xf32>
    %31 = vector.extract_strided_slice %23 {offsets = [56, 0], sizes = [8, 128], strides = [1, 1]} : vector<96x128xf32> to vector<8x128xf32>
    %32 = vector.extract_strided_slice %23 {offsets = [64, 0], sizes = [8, 128], strides = [1, 1]} : vector<96x128xf32> to vector<8x128xf32>
    %33 = vector.extract_strided_slice %23 {offsets = [72, 0], sizes = [8, 128], strides = [1, 1]} : vector<96x128xf32> to vector<8x128xf32>
    %34 = vector.extract_strided_slice %23 {offsets = [80, 0], sizes = [8, 128], strides = [1, 1]} : vector<96x128xf32> to vector<8x128xf32>
    %35 = vector.extract_strided_slice %23 {offsets = [88, 0], sizes = [8, 128], strides = [1, 1]} : vector<96x128xf32> to vector<8x128xf32>
    %36 = arith.mulf %24, %28 : vector<8x128xf32>
    %cst_8 = arith.constant dense<0.000000e+00> : vector<128xf32>
    %37 = vector.multi_reduction <add>, %36, %cst_8 [0] : vector<8x128xf32> to vector<128xf32>
    %38 = vector.shape_cast %37 : vector<128xf32> to vector<1x128xf32>
    %39 = arith.mulf %24, %29 : vector<8x128xf32>
    %cst_9 = arith.constant dense<0.000000e+00> : vector<128xf32>
    %40 = vector.multi_reduction <add>, %39, %cst_9 [0] : vector<8x128xf32> to vector<128xf32>
    %41 = vector.shape_cast %40 : vector<128xf32> to vector<1x128xf32>
    %42 = arith.mulf %24, %30 : vector<8x128xf32>
    %cst_10 = arith.constant dense<0.000000e+00> : vector<128xf32>
    %43 = vector.multi_reduction <add>, %42, %cst_10 [0] : vector<8x128xf32> to vector<128xf32>
    %44 = vector.shape_cast %43 : vector<128xf32> to vector<1x128xf32>
    %45 = arith.mulf %24, %31 : vector<8x128xf32>
    %cst_11 = arith.constant dense<0.000000e+00> : vector<128xf32>
    %46 = vector.multi_reduction <add>, %45, %cst_11 [0] : vector<8x128xf32> to vector<128xf32>
    %47 = vector.shape_cast %46 : vector<128xf32> to vector<1x128xf32>
    %48 = arith.maximumf %38, %41 : vector<1x128xf32>
    %49 = arith.maximumf %48, %44 : vector<1x128xf32>
    %50 = arith.maximumf %49, %47 : vector<1x128xf32>
    %51 = arith.subf %38, %50 : vector<1x128xf32>
    %52 = math.exp %51 : vector<1x128xf32>
    %53 = arith.subf %41, %50 : vector<1x128xf32>
    %54 = math.exp %53 : vector<1x128xf32>
    %55 = arith.subf %44, %50 : vector<1x128xf32>
    %56 = math.exp %55 : vector<1x128xf32>
    %57 = arith.subf %47, %50 : vector<1x128xf32>
    %58 = math.exp %57 : vector<1x128xf32>
    %59 = arith.addf %52, %54 : vector<1x128xf32>
    %60 = arith.addf %59, %56 : vector<1x128xf32>
    %61 = arith.addf %60, %58 : vector<1x128xf32>
    %cst_12 = arith.constant 1.000000e+00 : f32
    %62 = vector.broadcast %cst_12 : f32 to vector<1x128xf32>
    %63 = arith.divf %62, %61 : vector<1x128xf32>
    %64 = arith.mulf %52, %63 : vector<1x128xf32>
    %65 = vector.broadcast %64 : vector<1x128xf32> to vector<8x128xf32>
    %66 = arith.mulf %65, %32 : vector<8x128xf32>
    %67 = arith.mulf %54, %63 : vector<1x128xf32>
    %68 = vector.broadcast %67 : vector<1x128xf32> to vector<8x128xf32>
    %69 = arith.mulf %68, %33 : vector<8x128xf32>
    %70 = arith.addf %66, %69 : vector<8x128xf32>
    %71 = arith.mulf %56, %63 : vector<1x128xf32>
    %72 = vector.broadcast %71 : vector<1x128xf32> to vector<8x128xf32>
    %73 = arith.mulf %72, %34 : vector<8x128xf32>
    %74 = arith.addf %70, %73 : vector<8x128xf32>
    %75 = arith.mulf %58, %63 : vector<1x128xf32>
    %76 = vector.broadcast %75 : vector<1x128xf32> to vector<8x128xf32>
    %77 = arith.mulf %76, %35 : vector<8x128xf32>
    %78 = arith.addf %74, %77 : vector<8x128xf32>
    %79 = arith.mulf %25, %28 : vector<8x128xf32>
    %cst_13 = arith.constant dense<0.000000e+00> : vector<128xf32>
    %80 = vector.multi_reduction <add>, %79, %cst_13 [0] : vector<8x128xf32> to vector<128xf32>
    %81 = vector.shape_cast %80 : vector<128xf32> to vector<1x128xf32>
    %82 = arith.mulf %25, %29 : vector<8x128xf32>
    %cst_14 = arith.constant dense<0.000000e+00> : vector<128xf32>
    %83 = vector.multi_reduction <add>, %82, %cst_14 [0] : vector<8x128xf32> to vector<128xf32>
    %84 = vector.shape_cast %83 : vector<128xf32> to vector<1x128xf32>
    %85 = arith.mulf %25, %30 : vector<8x128xf32>
    %cst_15 = arith.constant dense<0.000000e+00> : vector<128xf32>
    %86 = vector.multi_reduction <add>, %85, %cst_15 [0] : vector<8x128xf32> to vector<128xf32>
    %87 = vector.shape_cast %86 : vector<128xf32> to vector<1x128xf32>
    %88 = arith.mulf %25, %31 : vector<8x128xf32>
    %cst_16 = arith.constant dense<0.000000e+00> : vector<128xf32>
    %89 = vector.multi_reduction <add>, %88, %cst_16 [0] : vector<8x128xf32> to vector<128xf32>
    %90 = vector.shape_cast %89 : vector<128xf32> to vector<1x128xf32>
    %91 = arith.maximumf %81, %84 : vector<1x128xf32>
    %92 = arith.maximumf %91, %87 : vector<1x128xf32>
    %93 = arith.maximumf %92, %90 : vector<1x128xf32>
    %94 = arith.subf %81, %93 : vector<1x128xf32>
    %95 = math.exp %94 : vector<1x128xf32>
    %96 = arith.subf %84, %93 : vector<1x128xf32>
    %97 = math.exp %96 : vector<1x128xf32>
    %98 = arith.subf %87, %93 : vector<1x128xf32>
    %99 = math.exp %98 : vector<1x128xf32>
    %100 = arith.subf %90, %93 : vector<1x128xf32>
    %101 = math.exp %100 : vector<1x128xf32>
    %102 = arith.addf %95, %97 : vector<1x128xf32>
    %103 = arith.addf %102, %99 : vector<1x128xf32>
    %104 = arith.addf %103, %101 : vector<1x128xf32>
    %cst_17 = arith.constant 1.000000e+00 : f32
    %105 = vector.broadcast %cst_17 : f32 to vector<1x128xf32>
    %106 = arith.divf %105, %104 : vector<1x128xf32>
    %107 = arith.mulf %95, %106 : vector<1x128xf32>
    %108 = vector.broadcast %107 : vector<1x128xf32> to vector<8x128xf32>
    %109 = arith.mulf %108, %32 : vector<8x128xf32>
    %110 = arith.mulf %97, %106 : vector<1x128xf32>
    %111 = vector.broadcast %110 : vector<1x128xf32> to vector<8x128xf32>
    %112 = arith.mulf %111, %33 : vector<8x128xf32>
    %113 = arith.addf %109, %112 : vector<8x128xf32>
    %114 = arith.mulf %99, %106 : vector<1x128xf32>
    %115 = vector.broadcast %114 : vector<1x128xf32> to vector<8x128xf32>
    %116 = arith.mulf %115, %34 : vector<8x128xf32>
    %117 = arith.addf %113, %116 : vector<8x128xf32>
    %118 = arith.mulf %101, %106 : vector<1x128xf32>
    %119 = vector.broadcast %118 : vector<1x128xf32> to vector<8x128xf32>
    %120 = arith.mulf %119, %35 : vector<8x128xf32>
    %121 = arith.addf %117, %120 : vector<8x128xf32>
    %122 = arith.mulf %26, %28 : vector<8x128xf32>
    %cst_18 = arith.constant dense<0.000000e+00> : vector<128xf32>
    %123 = vector.multi_reduction <add>, %122, %cst_18 [0] : vector<8x128xf32> to vector<128xf32>
    %124 = vector.shape_cast %123 : vector<128xf32> to vector<1x128xf32>
    %125 = arith.mulf %26, %29 : vector<8x128xf32>
    %cst_19 = arith.constant dense<0.000000e+00> : vector<128xf32>
    %126 = vector.multi_reduction <add>, %125, %cst_19 [0] : vector<8x128xf32> to vector<128xf32>
    %127 = vector.shape_cast %126 : vector<128xf32> to vector<1x128xf32>
    %128 = arith.mulf %26, %30 : vector<8x128xf32>
    %cst_20 = arith.constant dense<0.000000e+00> : vector<128xf32>
    %129 = vector.multi_reduction <add>, %128, %cst_20 [0] : vector<8x128xf32> to vector<128xf32>
    %130 = vector.shape_cast %129 : vector<128xf32> to vector<1x128xf32>
    %131 = arith.mulf %26, %31 : vector<8x128xf32>
    %cst_21 = arith.constant dense<0.000000e+00> : vector<128xf32>
    %132 = vector.multi_reduction <add>, %131, %cst_21 [0] : vector<8x128xf32> to vector<128xf32>
    %133 = vector.shape_cast %132 : vector<128xf32> to vector<1x128xf32>
    %134 = arith.maximumf %124, %127 : vector<1x128xf32>
    %135 = arith.maximumf %134, %130 : vector<1x128xf32>
    %136 = arith.maximumf %135, %133 : vector<1x128xf32>
    %137 = arith.subf %124, %136 : vector<1x128xf32>
    %138 = math.exp %137 : vector<1x128xf32>
    %139 = arith.subf %127, %136 : vector<1x128xf32>
    %140 = math.exp %139 : vector<1x128xf32>
    %141 = arith.subf %130, %136 : vector<1x128xf32>
    %142 = math.exp %141 : vector<1x128xf32>
    %143 = arith.subf %133, %136 : vector<1x128xf32>
    %144 = math.exp %143 : vector<1x128xf32>
    %145 = arith.addf %138, %140 : vector<1x128xf32>
    %146 = arith.addf %145, %142 : vector<1x128xf32>
    %147 = arith.addf %146, %144 : vector<1x128xf32>
    %cst_22 = arith.constant 1.000000e+00 : f32
    %148 = vector.broadcast %cst_22 : f32 to vector<1x128xf32>
    %149 = arith.divf %148, %147 : vector<1x128xf32>
    %150 = arith.mulf %138, %149 : vector<1x128xf32>
    %151 = vector.broadcast %150 : vector<1x128xf32> to vector<8x128xf32>
    %152 = arith.mulf %151, %32 : vector<8x128xf32>
    %153 = arith.mulf %140, %149 : vector<1x128xf32>
    %154 = vector.broadcast %153 : vector<1x128xf32> to vector<8x128xf32>
    %155 = arith.mulf %154, %33 : vector<8x128xf32>
    %156 = arith.addf %152, %155 : vector<8x128xf32>
    %157 = arith.mulf %142, %149 : vector<1x128xf32>
    %158 = vector.broadcast %157 : vector<1x128xf32> to vector<8x128xf32>
    %159 = arith.mulf %158, %34 : vector<8x128xf32>
    %160 = arith.addf %156, %159 : vector<8x128xf32>
    %161 = arith.mulf %144, %149 : vector<1x128xf32>
    %162 = vector.broadcast %161 : vector<1x128xf32> to vector<8x128xf32>
    %163 = arith.mulf %162, %35 : vector<8x128xf32>
    %164 = arith.addf %160, %163 : vector<8x128xf32>
    %165 = arith.mulf %27, %28 : vector<8x128xf32>
    %cst_23 = arith.constant dense<0.000000e+00> : vector<128xf32>
    %166 = vector.multi_reduction <add>, %165, %cst_23 [0] : vector<8x128xf32> to vector<128xf32>
    %167 = vector.shape_cast %166 : vector<128xf32> to vector<1x128xf32>
    %168 = arith.mulf %27, %29 : vector<8x128xf32>
    %cst_24 = arith.constant dense<0.000000e+00> : vector<128xf32>
    %169 = vector.multi_reduction <add>, %168, %cst_24 [0] : vector<8x128xf32> to vector<128xf32>
    %170 = vector.shape_cast %169 : vector<128xf32> to vector<1x128xf32>
    %171 = arith.mulf %27, %30 : vector<8x128xf32>
    %cst_25 = arith.constant dense<0.000000e+00> : vector<128xf32>
    %172 = vector.multi_reduction <add>, %171, %cst_25 [0] : vector<8x128xf32> to vector<128xf32>
    %173 = vector.shape_cast %172 : vector<128xf32> to vector<1x128xf32>
    %174 = arith.mulf %27, %31 : vector<8x128xf32>
    %cst_26 = arith.constant dense<0.000000e+00> : vector<128xf32>
    %175 = vector.multi_reduction <add>, %174, %cst_26 [0] : vector<8x128xf32> to vector<128xf32>
    %176 = vector.shape_cast %175 : vector<128xf32> to vector<1x128xf32>
    %177 = arith.maximumf %167, %170 : vector<1x128xf32>
    %178 = arith.maximumf %177, %173 : vector<1x128xf32>
    %179 = arith.maximumf %178, %176 : vector<1x128xf32>
    %180 = arith.subf %167, %179 : vector<1x128xf32>
    %181 = math.exp %180 : vector<1x128xf32>
    %182 = arith.subf %170, %179 : vector<1x128xf32>
    %183 = math.exp %182 : vector<1x128xf32>
    %184 = arith.subf %173, %179 : vector<1x128xf32>
    %185 = math.exp %184 : vector<1x128xf32>
    %186 = arith.subf %176, %179 : vector<1x128xf32>
    %187 = math.exp %186 : vector<1x128xf32>
    %188 = arith.addf %181, %183 : vector<1x128xf32>
    %189 = arith.addf %188, %185 : vector<1x128xf32>
    %190 = arith.addf %189, %187 : vector<1x128xf32>
    %cst_27 = arith.constant 1.000000e+00 : f32
    %191 = vector.broadcast %cst_27 : f32 to vector<1x128xf32>
    %192 = arith.divf %191, %190 : vector<1x128xf32>
    %193 = arith.mulf %181, %192 : vector<1x128xf32>
    %194 = vector.broadcast %193 : vector<1x128xf32> to vector<8x128xf32>
    %195 = arith.mulf %194, %32 : vector<8x128xf32>
    %196 = arith.mulf %183, %192 : vector<1x128xf32>
    %197 = vector.broadcast %196 : vector<1x128xf32> to vector<8x128xf32>
    %198 = arith.mulf %197, %33 : vector<8x128xf32>
    %199 = arith.addf %195, %198 : vector<8x128xf32>
    %200 = arith.mulf %185, %192 : vector<1x128xf32>
    %201 = vector.broadcast %200 : vector<1x128xf32> to vector<8x128xf32>
    %202 = arith.mulf %201, %34 : vector<8x128xf32>
    %203 = arith.addf %199, %202 : vector<8x128xf32>
    %204 = arith.mulf %187, %192 : vector<1x128xf32>
    %205 = vector.broadcast %204 : vector<1x128xf32> to vector<8x128xf32>
    %206 = arith.mulf %205, %35 : vector<8x128xf32>
    %207 = arith.addf %203, %206 : vector<8x128xf32>
    %208 = tpu.concatenate %78, %121, %164, %207 in 0 : vector<8x128xf32>, vector<8x128xf32>, vector<8x128xf32>, vector<8x128xf32> -> vector<32x128xf32>
    %209 = vector.broadcast %14 : vector<32x1xf32> to vector<32x128xf32>
    %210 = arith.addf %208, %209 : vector<32x128xf32>
    %211 = arith.addf %210, %3 : vector<32x128xf32>
    %cst_28 = arith.constant dense<0.000000e+00> : vector<128xf32>
    %212 = vector.multi_reduction <add>, %211, %cst_28 [0] : vector<32x128xf32> to vector<128xf32>
    %213 = vector.shape_cast %212 : vector<128xf32> to vector<1x128xf32>
    %cst_29 = arith.constant 3.200000e+01 : f32
    %214 = vector.broadcast %cst_29 : f32 to vector<1x128xf32>
    %215 = arith.divf %213, %214 : vector<1x128xf32>
    %216 = vector.broadcast %215 : vector<1x128xf32> to vector<32x128xf32>
    %217 = arith.subf %211, %216 : vector<32x128xf32>
    %218 = arith.mulf %217, %217 : vector<32x128xf32>
    %cst_30 = arith.constant dense<0.000000e+00> : vector<128xf32>
    %219 = vector.multi_reduction <add>, %218, %cst_30 [0] : vector<32x128xf32> to vector<128xf32>
    %220 = vector.shape_cast %219 : vector<128xf32> to vector<1x128xf32>
    %cst_31 = arith.constant 3.200000e+01 : f32
    %221 = vector.broadcast %cst_31 : f32 to vector<1x128xf32>
    %222 = arith.divf %220, %221 : vector<1x128xf32>
    %cst_32 = arith.constant 9.99999974E-6 : f32
    %223 = vector.broadcast %cst_32 : f32 to vector<1x128xf32>
    %224 = arith.addf %222, %223 : vector<1x128xf32>
    %225 = math.rsqrt %224 : vector<1x128xf32>
    %226 = vector.broadcast %215 : vector<1x128xf32> to vector<32x128xf32>
    %227 = arith.subf %211, %226 : vector<32x128xf32>
    %228 = vector.broadcast %225 : vector<1x128xf32> to vector<32x128xf32>
    %229 = arith.mulf %227, %228 : vector<32x128xf32>
    %230 = vector.broadcast %15 : vector<32x1xf32> to vector<32x128xf32>
    %231 = arith.mulf %229, %230 : vector<32x128xf32>
    %232 = vector.broadcast %16 : vector<32x1xf32> to vector<32x128xf32>
    %233 = arith.addf %231, %232 : vector<32x128xf32>
    %234 = arith.truncf %233 : vector<32x128xf32> to vector<32x128xbf16>
    %cst_33 = arith.constant dense<0.000000e+00> : vector<32x128xf32>
    %235 = tpu.matmul %9, %234, %cst_33 {dimension_numbers = #tpu.dot_dimension_numbers<[1], [0], [0], [1], [0, 0, 1, 1], [], []>} : vector<32x32xbf16>, vector<32x128xbf16>, vector<32x128xf32> -> vector<32x128xf32>
    %236 = vector.broadcast %17 : vector<32x1xf32> to vector<32x128xf32>
    %237 = arith.addf %235, %236 : vector<32x128xf32>
    %238 = arith.addf %237, %233 : vector<32x128xf32>
    %cst_34 = arith.constant dense<0.000000e+00> : vector<128xf32>
    %239 = vector.multi_reduction <add>, %238, %cst_34 [0] : vector<32x128xf32> to vector<128xf32>
    %240 = vector.shape_cast %239 : vector<128xf32> to vector<1x128xf32>
    %cst_35 = arith.constant 3.200000e+01 : f32
    %241 = vector.broadcast %cst_35 : f32 to vector<1x128xf32>
    %242 = arith.divf %240, %241 : vector<1x128xf32>
    %243 = vector.broadcast %242 : vector<1x128xf32> to vector<32x128xf32>
    %244 = arith.subf %238, %243 : vector<32x128xf32>
    %245 = arith.mulf %244, %244 : vector<32x128xf32>
    %cst_36 = arith.constant dense<0.000000e+00> : vector<128xf32>
    %246 = vector.multi_reduction <add>, %245, %cst_36 [0] : vector<32x128xf32> to vector<128xf32>
    %247 = vector.shape_cast %246 : vector<128xf32> to vector<1x128xf32>
    %cst_37 = arith.constant 3.200000e+01 : f32
    %248 = vector.broadcast %cst_37 : f32 to vector<1x128xf32>
    %249 = arith.divf %247, %248 : vector<1x128xf32>
    %cst_38 = arith.constant 9.99999974E-6 : f32
    %250 = vector.broadcast %cst_38 : f32 to vector<1x128xf32>
    %251 = arith.addf %249, %250 : vector<1x128xf32>
    %252 = math.rsqrt %251 : vector<1x128xf32>
    %253 = vector.broadcast %242 : vector<1x128xf32> to vector<32x128xf32>
    %254 = arith.subf %238, %253 : vector<32x128xf32>
    %255 = vector.broadcast %252 : vector<1x128xf32> to vector<32x128xf32>
    %256 = arith.mulf %254, %255 : vector<32x128xf32>
    %257 = vector.broadcast %18 : vector<32x1xf32> to vector<32x128xf32>
    %258 = arith.mulf %256, %257 : vector<32x128xf32>
    %259 = vector.broadcast %19 : vector<32x1xf32> to vector<32x128xf32>
    %260 = arith.addf %258, %259 : vector<32x128xf32>
    %c0_39 = arith.constant 0 : index
    %c0_40 = arith.constant 0 : index
    %261 = vector.load %arg6[%c0_39, %c0_40] : memref<32x128xf32, #tpu.memory_space<vmem>>, vector<32x128xf32>
    tpu.vector_store %arg6[%c0_39, %c0_40], %260 {strides = array<i32>} : memref<32x128xf32, #tpu.memory_space<vmem>>, vector<32x128xf32>,
    return
  }
  func.func @transform_0(%arg0: i32, %arg1: i32) -> (i32, i32) {
    %c0_i32 = arith.constant 0 : i32
    %c0_i32_0 = arith.constant 0 : i32
    return %c0_i32, %arg0 : i32, i32
  }
  func.func @transform_1(%arg0: i32, %arg1: i32) -> (i32, i32, i32) {
    %c0_i32 = arith.constant 0 : i32
    %c0_i32_0 = arith.constant 0 : i32
    %c0_i32_1 = arith.constant 0 : i32
    %c0_i32_2 = arith.constant 0 : i32
    return %c0_i32, %c0_i32_0, %c0_i32_1 : i32, i32, i32
  }
  func.func @transform_2(%arg0: i32, %arg1: i32) -> (i32, i32, i32) {
    %c0_i32 = arith.constant 0 : i32
    %c0_i32_0 = arith.constant 0 : i32
    %c0_i32_1 = arith.constant 0 : i32
    %c0_i32_2 = arith.constant 0 : i32
    return %c0_i32, %c0_i32_0, %c0_i32_1 : i32, i32, i32
  }
  func.func @transform_3(%arg0: i32, %arg1: i32) -> (i32, i32, i32) {
    %c0_i32 = arith.constant 0 : i32
    %c0_i32_0 = arith.constant 0 : i32
    %c0_i32_1 = arith.constant 0 : i32
    %c0_i32_2 = arith.constant 0 : i32
    return %c0_i32, %c0_i32_0, %c0_i32_1 : i32, i32, i32
  }
  func.func @transform_4(%arg0: i32, %arg1: i32) -> (i32, i32) {
    %c0_i32 = arith.constant 0 : i32
    %c0_i32_0 = arith.constant 0 : i32
    return %c0_i32, %arg0 : i32, i32
  }
}

</mosaic_0001>

<bundles_post_ra>
// kernel: tpu_custom_call.1
= control target key start
LH: loop header
LB: loop body
LE: loop exit
PB: predicated region body
PF: predicated region fallthrough
CT: control target
= control target key end

     0   :  { %9 = vsyncpa [#allocation3], 0  ;;  %s1300_s15 = smov 0   ;;  %s1302_s16 = smov 0   ;;  %s1478_s0 = inlined_call_operand.vmem [shape: f32[32,128], index: 0, kind: input, shape index: {}]   ;;  %s1479_s1 = inlined_call_operand.vmem [shape: bf16[2,96,32], index: 1, kind: input, shape index: {}]   ;;  %s1480_s2 = inlined_call_operand.vmem [shape: bf16[2,32,32], index: 2, kind: input, shape index: {}]   ;;  %s1481_s3 = inlined_call_operand.vmem [shape: f32[2,288,1], index: 3, kind: input, shape index: {}]   ;;  %s1482_s4 = inlined_call_operand.hbm [shape: f32[32,128], index: 4, kind: output, shape index: {}]  }
   0x1   :  { %s1304_s17 = smov 0  }
   0x2 LB: > { %s1061_s18 = sadd.s32 4294967295, %s1269_s17   ;;  %s24_s19 = sadd.s32 1, %s1265_s16  ;;  %s1269_s17 = sphi %s1304_s17, %s15_s17   ;;  %s1265_s16 = sphi %s1302_s16, %s1485_s16   ;;  %s1261_s15 = sphi %s1300_s15, %s1484_s15  }
   0x3   : > { %p25_p0 = scmp.ge.s32.totalorder %s24_s19, 2  ;;  %p1064_p1 = scmp.ge.s32.totalorder %s1269_s17, 1 }
   0x4   : > { %p174_p2 = scmp.lt.s32.totalorder %s1269_s17, 3 }
   0x5   : > { %s1487_s19 = smov (%p25_p0, %s24_s19), 0 }
   0x6   : > { %p175_p3 = pnand %p1064_p1, %p174_p2 }
   0x7   : > { %p1065_p4 = scmp.ne.s32.totalorder (!%p175_p3), %s1261_s15, 0 }
   0x8   : > { %178 = sbr.rel (%p175_p3) target bundleno = 688 (0x2b0), region = 36 }
   0xd   : > { %202 = sbr.rel (%p1065_p4) target bundleno = 21 (0x15), region = 40 }
  0x12   : > { %v203_v0 = vld [vmem:[%s1478_s0] sm:$0xff]  ;;  %v204_v1 = vld [vmem:[%s1478_s0 + $0x8] sm:$0xff]  ;;  %v205_v2 = vld [vmem:[%s1478_s0 + $0x10] sm:$0xff] }
  0x13   : > { %207 = vst [vmem:[#allocation2] sm:$0xff] %v203_v0  ;;  %208 = vst [vmem:[#allocation2 + $0x8] sm:$0xff] %v204_v1  ;;  %v206_v3 = vld [vmem:[%s1478_s0 + $0x18] sm:$0xff] }
  0x14   : > { %209 = vst [vmem:[#allocation2 + $0x10] sm:$0xff] %v205_v2  ;;  %210 = vst [vmem:[#allocation2 + $0x18] sm:$0xff] %v206_v3 }
  0x15 PF: > { %s1089_s28 = smul.u32 48, %s1261_s15  ;;  %v1271_v9 = vmov 0   ;;  %vm367_vm0 = vcmask 261120   ;;  %s1090_s10 = sshll.u32 %s1261_s15, 4 }
  0x16   : > { %1166 = vset.pattern.permute.xlu1 %v1271_v9  ;;  %1165 = vset.pattern.permute.xlu0 %v1271_v9  ;;  %s237_s29 = smul.u32 288, %s1261_s15  ;;  %s1441_s13 = scalar_lea.vmem %s1480_s2, %s1090_s10 }
  0x17   : > { %s1351_s6 = scalar_lea.vmem %s1479_s1, %s1089_s28  ;;  %s1272_s14 = smov [#allocation2]  }
  0x18   : > { %v1167_v11 = vld [vmem:[%s1351_s6] sm:$0xff]   ;;  %s1358_s9 = scalar_lea.vmem %s1481_s3, %s237_s29  ;;  %v1169_v13 = vld [vmem:[%s1351_s6 + $0x8] sm:$0xff]   ;;  %v1171_v17 = vld [vmem:[%s1351_s6 + $0x10] sm:$0xff]   ;;  %s999_s15 = sshll.u32 %s1272_s14, 4  ;;  %s1000_s15 = int_to_ptr.vmem [resolvable:$true] %s999_s15 }
  0x19   : > { %v1168_v12 = vld [vmem:[%s1351_s6 + $0x20] sm:$0xff]   ;;  %1107 = vmatprep.mubr.msk.bf16.mxu0 %vm367_vm0, %v1167_v11  ;;  %v1170_v14 = vld [vmem:[%s1351_s6 + $0x28] sm:$0xff]   ;;  %v245_v20 = vld [vmem:[%s1358_s9 + $0x30] sm:$0xff]  ;;  %p1454_p5 = scmp.eq.s32.totalorder %s1061_s18, 1  ;;  %s1219_s21 = scalar_lea.vmem %s1000_s15, 512 }
  0x1a   : > { %v1338_v6 = vld [vmem:[#allocation2] sm:$0xff]  ;;  %v1343_v8 = vld [vmem:[#allocation2 + $0x8] sm:$0xff]  ;;  %1115 = vmatprep.mubr.msk.bf16.mxu1 %vm367_vm0, %v1168_v12  ;;  %v241_v21 = vld [vmem:[%s1358_s9 + $0x10] sm:$0xff]  ;;  %p1220_p6 = scmp.ne.s32.totalorder %s1000_s15, %s1219_s21  ;;  %p1226_p9 = scmp.lt.s32.totalorder %s1000_s15, %s1000_s15 }
  0x1b   : > { %v1334_v4 = vld [vmem:[#allocation2 + $0x10] sm:$0xff]  ;;  %v1336_v5 = vld [vmem:[#allocation2 + $0x18] sm:$0xff]  ;;  %v275_v10 = vpack.c.bf16 %v1343_v8, %v1338_v6  ;;  %v243_v15 = vld [vmem:[%s1358_s9 + $0x20] sm:$0xff]  ;;  %p1227_p10 = scmp.lt.s32.totalorder %s1219_s21, %s1219_s21 }
  0x1c   : > { %v276_v7 = vpack.c.bf16 %v1336_v5, %v1334_v4  ;;  %v239_v16 = vld [vmem:[%s1358_s9] sm:$0xff]  ;;  %299 = vperm.xlu1 %1166, %v243_v15   ;;  %v244_v18 = vld [vmem:[%s1358_s9 + $0x28] sm:$0xff]  ;;  %v1172_v22 = vld [vmem:[%s1351_s6 + $0x18] sm:$0xff]   ;;  %p1221_p7 = pnand %p1220_p6, %p1454_p5 }
  0x1d   : > { %279 = vperm.xlu0 %1165, %v239_v16   ;;  %v240_v19 = vld [vmem:[%s1358_s9 + $0x8] sm:$0xff]  ;;  %v246_v23 = vld [vmem:[%s1358_s9 + $0x38] sm:$0xff]  ;;  %v247_v26 = vld [vmem:[%s1358_s9 + $0x40] sm:$0xff]  ;;  %p1228_p11 = por %p1227_p10, %p1226_p9 }
  0x1e   : > { %1103 = vmatprep.subr.bf16.mxu0 %v276_v7  ;;  %1127 = vmatprep.subr.bf16.mxu1 %v276_v7  ;;  %v242_v24 = vld [vmem:[%s1358_s9 + $0x18] sm:$0xff]  ;;  %v248_v25 = vld [vmem:[%s1358_s9 + $0x48] sm:$0xff]  ;;  %v249_v28 = vld [vmem:[%s1358_s9 + $0x50] sm:$0xff]  ;;  %p1222_p8 = pneg %p1221_p7 }
  0x1f   : > { %1104 = vmatpush3.bf16.msra.mxu0 %v276_v7  ;;  %1129 = vmatpush3.bf16.msra.mxu1 %v276_v7  ;;  %v250_v27 = vld [vmem:[%s1358_s9 + $0x58] sm:$0xff]  ;;  %v252_v29 = vld [vmem:[%s1358_s9 + $0x68] sm:$0xff]  ;;  %v251_v30 = vld [vmem:[%s1358_s9 + $0x60] sm:$0xff] }
  0x20   : > { %1105 = vmatprep.subr.bf16.mxu0 %v275_v10  ;;  %1128 = vmatprep.subr.bf16.mxu1 %v275_v10  ;;  %v254_v31 = vld [vmem:[%s1358_s9 + $0x78] sm:$0xff]  ;;  %v253_v32 = vld [vmem:[%s1358_s9 + $0x70] sm:$0xff]  ;;  %v256_v37 = vld [vmem:[%s1358_s9 + $0x88] sm:$0xff]  ;;  %p1229_p12 = pnand %p1228_p11, %p1222_p8 }
  0x21   : > { %304 = vperm.xlu1 %1166, %v244_v18   ;;  %284 = vperm.xlu0 %1165, %v240_v19   ;;  %v258_v33 = vld [vmem:[%s1358_s9 + $0x98] sm:$0xff]  ;;  %v257_v34 = vld [vmem:[%s1358_s9 + $0x90] sm:$0xff]  ;;  %v255_v38 = vld [vmem:[%s1358_s9 + $0x80] sm:$0xff] }
  0x22   : > { %v262_v35 = vld [vmem:[%s1358_s9 + $0xb8] sm:$0xff]  ;;  %v261_v36 = vld [vmem:[%s1358_s9 + $0xb0] sm:$0xff]  ;;  %v260_v39 = vld [vmem:[%s1358_s9 + $0xa8] sm:$0xff] }
  0x23   : > { %1106 = vmatpush3.bf16.msra.mxu0 %v275_v10  ;;  %1130 = vmatpush3.bf16.msra.mxu1 %v275_v10  ;;  %v259_v40 = vld [vmem:[%s1358_s9 + $0xa0] sm:$0xff]  ;;  %v264_v41 = vld [vmem:[%s1358_s9 + $0xc8] sm:$0xff]  ;;  %v266_v43 = vld [vmem:[%s1358_s9 + $0xd8] sm:$0xff] }
  0x24   : > { %v263_v42 = vld [vmem:[%s1358_s9 + $0xc0] sm:$0xff]  ;;  %v265_v44 = vld [vmem:[%s1358_s9 + $0xd0] sm:$0xff]  ;;  %v268_v45 = vld [vmem:[%s1358_s9 + $0xe8] sm:$0xff] }
  0x25   : > { %309 = vperm.xlu1 %1166, %v245_v20   ;;  %289 = vperm.xlu0 %1165, %v241_v21   ;;  %v267_v46 = vld [vmem:[%s1358_s9 + $0xe0] sm:$0xff]  ;;  %v270_v47 = vld [vmem:[%s1358_s9 + $0xf8] sm:$0xff]  ;;  %v269_v48 = vld [vmem:[%s1358_s9 + $0xf0] sm:$0xff] }
  0x26   : > { %1108 = vmatmul.mubr.msk.bf16.vlgmr.msra.gmra.mxu0 %vm367_vm0, %v1169_v13  ;;  %1116 = vmatmul.mubr.msk.bf16.vlgmr.msra.gmra.mxu1 %vm367_vm0, %v1170_v14  ;;  %v272_v49 = vld [vmem:[%s1358_s9 + $0x108] sm:$0xff]  ;;  %v271_v50 = vld [vmem:[%s1358_s9 + $0x100] sm:$0xff]  ;;  %v274_v51 = vld [vmem:[%s1358_s9 + $0x118] sm:$0xff] }
  0x27   : > { %1111 = vmatprep.mubr.msk.bf16.mxu0 %vm367_vm0, %v1171_v17  ;;  %v273_v52 = vld [vmem:[%s1358_s9 + $0x110] sm:$0xff] }
  0x29   : > { %314 = vperm.xlu1 %1166, %v246_v23   ;;  %294 = vperm.xlu0 %1165, %v242_v24  }
  0x2d   : > { %324 = vperm.xlu1 %1166, %v248_v25   ;;  %319 = vperm.xlu0 %1165, %v247_v26  }
  0x2e   : > { %1112 = vmatmul.mubr.msk.bf16.gmra.mxu0 %vm367_vm0, %v1172_v22 }
  0x31   : > { %334 = vperm.xlu1 %1166, %v250_v27   ;;  %329 = vperm.xlu0 %1165, %v249_v28  }
  0x35   : > { %710 = vperm.xlu1 %1166, %v252_v29   ;;  %705 = vperm.xlu0 %1165, %v251_v30  }
  0x39   : > { %720 = vperm.xlu1 %1166, %v254_v31   ;;  %715 = vperm.xlu0 %1165, %v253_v32  }
  0x3d   : > { %783 = vperm.xlu1 %1166, %v258_v33   ;;  %778 = vperm.xlu0 %1165, %v257_v34  }
  0x41   : > { %807 = vperm.xlu1 %1166, %v262_v35   ;;  %802 = vperm.xlu0 %1165, %v261_v36  }
  0x45   : > { %773 = vperm.xlu1 %1166, %v256_v37   ;;  %768 = vperm.xlu0 %1165, %v255_v38  }
  0x49   : > { %797 = vperm.xlu1 %1166, %v260_v39   ;;  %792 = vperm.xlu0 %1165, %v259_v40  }
  0x4d   : > { %823 = vperm.xlu1 %1166, %v264_v41   ;;  %818 = vperm.xlu0 %1165, %v263_v42  }
  0x51   : > { %833 = vperm.xlu1 %1166, %v266_v43   ;;  %828 = vperm.xlu0 %1165, %v265_v44  }
  0x55   : > { %946 = vperm.xlu1 %1166, %v268_v45   ;;  %941 = vperm.xlu0 %1165, %v267_v46  }
  0x59   : > { %956 = vperm.xlu1 %1166, %v270_v47   ;;  %951 = vperm.xlu0 %1165, %v269_v48  }
  0x5d   : > { %970 = vperm.xlu1 %1166, %v272_v49   ;;  %965 = vperm.xlu0 %1165, %v271_v50  }
  0x61   : > { %980 = vperm.xlu1 %1166, %v274_v51   ;;  %975 = vperm.xlu0 %1165, %v273_v52  }
  0x97   : > { %v300_v54 = vpop.permute.xlu1 %299 }
  0x98   : > { %v280_v53 = vpop.permute.xlu0 %279 }
  0x9c   : > { %v285_v55 = vpop.permute.xlu0 %284  ;;  %v305_v57 = vpop.permute.xlu1 %304 }
  0xa0   : > { %v290_v58 = vpop.permute.xlu0 %289  ;;  %v310_v62 = vpop.permute.xlu1 %309 }
  0xa4   : > { %v295_v63 = vpop.permute.xlu0 %294  ;;  %v315_v51 = vpop.permute.xlu1 %314 }
  0xe6   : > { %v1109_v56 = vpop.f32.mrf.mxu0 }
  0xe7   : > { %v1406_v0 = vadd.f32 %v1109_v56, %v290_v58 }
  0xe8   : > { %v420_v59 = vpop.f32.mrf.mxu0 }
  0xe9   : > { %v421_v2 = vadd.f32 %v420_v59, %v280_v53 }
  0xea   : > { %v1110_v60 = vpop.f32.mrf.mxu0 }
  0xeb   : > { %v432_v3 = vadd.f32 %v1110_v60, %v295_v63 }
  0xec   : > { %v423_v61 = vpop.f32.mrf.mxu0 }
  0xed   : > { %v424_v7 = vadd.f32 %v423_v61, %v285_v55 }
  0xee   : > { %v1113_v1 = vpop.f32.mrf.mxu0 }
  0xef   : > { %v445_v9 = vadd.f32 %v1113_v1, %v310_v62 }
  0xf0   : > { %v436_v10 = vpop.f32.mrf.mxu0 }
  0xf1   : > { %v481_v11 = vmul.f32 %v445_v9, %v421_v2  ;;  %v540_v12 = vmul.f32 %v445_v9, %v424_v7  ;;  %v599_v13 = vmul.f32 %v445_v9, %v1406_v0  ;;  %v658_v14 = vmul.f32 %v445_v9, %v432_v3 }
  0xf2   : > { %v437_v15 = vadd.f32 %v436_v10, %v300_v54  ;;  %v1114_v40 = vpop.f32.mrf.mxu0 }
  0xf3   : > { %v482_v16 = vrot.slane %v481_v11, 4  ;;  %v541_v17 = vrot.slane %v540_v12, 4  ;;  %v600_v18 = vrot.slane %v599_v13, 4  ;;  %v659_v19 = vrot.slane %v658_v14, 4 }
  0xf4   : > { %v467_v20 = vmul.f32 %v437_v15, %v421_v2  ;;  %v526_v21 = vmul.f32 %v437_v15, %v424_v7  ;;  %v585_v22 = vmul.f32 %v437_v15, %v1406_v0  ;;  %v644_v23 = vmul.f32 %v437_v15, %v432_v3  ;;  %v439_v50 = vpop.f32.mrf.mxu0 }
  0xf5   : > { %v483_v24 = vadd.f32 %v482_v16, %v481_v11  ;;  %v542_v25 = vadd.f32 %v541_v17, %v540_v12  ;;  %v601_v26 = vadd.f32 %v600_v18, %v599_v13  ;;  %v660_v27 = vadd.f32 %v659_v19, %v658_v14 }
  0xf6   : > { %v468_v28 = vrot.slane %v467_v20, 4  ;;  %v527_v29 = vrot.slane %v526_v21, 4  ;;  %v586_v30 = vrot.slane %v585_v22, 4  ;;  %v645_v31 = vrot.slane %v644_v23, 4 }
  0xf7   : > { %v484_v32 = vrot.slane %v483_v24, 2  ;;  %v543_v33 = vrot.slane %v542_v25, 2  ;;  %v602_v34 = vrot.slane %v601_v26, 2  ;;  %v661_v35 = vrot.slane %v660_v27, 2 }
  0xf8   : > { %v469_v36 = vadd.f32 %v468_v28, %v467_v20  ;;  %v528_v37 = vadd.f32 %v527_v29, %v526_v21  ;;  %v587_v38 = vadd.f32 %v586_v30, %v585_v22  ;;  %v646_v39 = vadd.f32 %v645_v31, %v644_v23 }
  0xf9   : > { %v485_v41 = vadd.f32 %v484_v32, %v483_v24  ;;  %v1410_v42 = vadd.f32 %v543_v33, %v542_v25  ;;  %v1412_v43 = vadd.f32 %v602_v34, %v601_v26  ;;  %v1414_v44 = vadd.f32 %v661_v35, %v660_v27 }
  0xfa   : > { %v470_v45 = vrot.slane %v469_v36, 2  ;;  %v529_v47 = vrot.slane %v528_v37, 2  ;;  %v588_v48 = vrot.slane %v587_v38, 2  ;;  %v647_v49 = vrot.slane %v646_v39, 2 }
  0xfb   : > { %v486_v46 = vrot.slane %v485_v41, 1  ;;  %v545_v52 = vrot.slane %v1410_v42, 1  ;;  %v604_v53 = vrot.slane %v1412_v43, 1  ;;  %v663_v54 = vrot.slane %v1414_v44, 1 }
  0xfc   : > { %v471_v55 = vadd.f32 %v470_v45, %v469_v36  ;;  %v448_v56 = vadd.f32 %v1114_v40, %v315_v51  ;;  %v440_v58 = vadd.f32 %v439_v50, %v305_v57  ;;  %v530_v60 = vadd.f32 %v529_v47, %v528_v37 }
  0xfd   : > { %v1419_v59 = vadd.f32 %v486_v46, %v485_v41  ;;  %v589_v61 = vadd.f32 %v588_v48, %v587_v38  ;;  %v648_v62 = vadd.f32 %v647_v49, %v646_v39 }
  0xfe   : > { %v488_v63 = vmul.f32 %v448_v56, %v421_v2  ;;  %v547_v1 = vmul.f32 %v448_v56, %v424_v7  ;;  %v606_v9 = vmul.f32 %v448_v56, %v1406_v0  ;;  %v665_v10 = vmul.f32 %v448_v56, %v432_v3 }
  0xff   : > { %v474_v11 = vmul.f32 %v440_v58, %v421_v2  ;;  %v533_v12 = vmul.f32 %v440_v58, %v424_v7  ;;  %v592_v13 = vmul.f32 %v440_v58, %v1406_v0  ;;  %v651_v14 = vmul.f32 %v440_v58, %v432_v3 }
 0x100   : > { %v489_v15 = vrot.slane %v488_v63, 4  ;;  %v548_v16 = vrot.slane %v547_v1, 4  ;;  %v607_v17 = vrot.slane %v606_v9, 4  ;;  %v666_v18 = vrot.slane %v665_v10, 4 }
 0x101   : > { %v475_v57 = vrot.slane %v474_v11, 4  ;;  %v534_v19 = vrot.slane %v533_v12, 4  ;;  %v593_v20 = vrot.slane %v592_v13, 4  ;;  %v652_v21 = vrot.slane %v651_v14, 4 }
 0x102   : > { %v472_v22 = vrot.slane %v471_v55, 1  ;;  %v490_v23 = vadd.f32 %v489_v15, %v488_v63  ;;  %v549_v24 = vadd.f32 %v548_v16, %v547_v1  ;;  %v608_v25 = vadd.f32 %v607_v17, %v606_v9 }
 0x103   : > { %v476_v26 = vadd.f32 %v475_v57, %v474_v11  ;;  %v535_v27 = vadd.f32 %v534_v19, %v533_v12  ;;  %v594_v28 = vadd.f32 %v593_v20, %v592_v13  ;;  %v653_v2 = vadd.f32 %v652_v21, %v651_v14 }
 0x104   : > { %v491_v7 = vrot.slane %v490_v23, 2  ;;  %v550_v29 = vrot.slane %v549_v24, 2  ;;  %v609_v0 = vrot.slane %v608_v25, 2  ;;  %v667_v3 = vadd.f32 %v666_v18, %v665_v10 }
 0x105   : > { %v477_v30 = vrot.slane %v476_v26, 2  ;;  %v536_v31 = vrot.slane %v535_v27, 2  ;;  %v595_v32 = vrot.slane %v594_v28, 2  ;;  %v654_v33 = vrot.slane %v653_v2, 2 }
 0x106   : > { %v531_v34 = vrot.slane %v530_v60, 1  ;;  %v590_v35 = vrot.slane %v589_v61, 1  ;;  %v492_v36 = vadd.f32 %v491_v7, %v490_v23  ;;  %v551_v37 = vadd.f32 %v550_v29, %v549_v24 }
 0x107   : > { %v478_v38 = vadd.f32 %v477_v30, %v476_v26  ;;  %v537_v39 = vadd.f32 %v536_v31, %v535_v27  ;;  %v596_v40 = vadd.f32 %v595_v32, %v594_v28  ;;  %v655_v41 = vadd.f32 %v654_v33, %v653_v2 }
 0x108   : > { %v473_v45 = vadd.f32 %v472_v22, %v471_v55  ;;  %v649_v46 = vrot.slane %v648_v62, 1  ;;  %v610_v47 = vadd.f32 %v609_v0, %v608_v25  ;;  %v668_v48 = vrot.slane %v667_v3, 2 }
 0x109   : > { %v479_v49 = vrot.slane %v478_v38, 1  ;;  %v538_v50 = vrot.slane %v537_v39, 1  ;;  %v597_v51 = vrot.slane %v596_v40, 1  ;;  %v656_v56 = vrot.slane %v655_v41, 1 }
 0x10a   : > { %v532_v58 = vadd.f32 %v531_v34, %v530_v60  ;;  %v591_v63 = vadd.f32 %v590_v35, %v589_v61  ;;  %v493_v1 = vrot.slane %v492_v36, 1  ;;  %v552_v9 = vrot.slane %v551_v37, 1 }
 0x10b   : > { %v480_v10 = vadd.f32 %v479_v49, %v478_v38  ;;  %v539_v11 = vadd.f32 %v538_v50, %v537_v39  ;;  %v598_v12 = vadd.f32 %v597_v51, %v596_v40  ;;  %v1423_v13 = vadd.f32 %v656_v56, %v655_v41  ;;  %v1173_v49 = vld [vmem:[%s1441_s13] sm:$0xff]  }
 0x10c   : > { %v546_v55 = vadd.f32 %v545_v52, %v1410_v42  ;;  %v650_v14 = vadd.f32 %v649_v46, %v648_v62  ;;  %v611_v15 = vrot.slane %v610_v47, 1  ;;  %v669_v16 = vadd.f32 %v668_v48, %v667_v3  ;;  %1123 = vmatprep.mubr.msk.bf16.mxu1 %vm367_vm0, %v1173_v49 }
 0x10d   : > { %v605_v17 = vadd.f32 %v604_v53, %v1412_v43  ;;  %v495_v60 = vmax.f32 %v473_v45, %v480_v10  ;;  %v554_v61 = vmax.f32 %v532_v58, %v539_v11  ;;  %v613_v18 = vmax.f32 %v591_v63, %v598_v12 }
 0x10e   : > { %v494_v57 = vadd.f32 %v493_v1, %v492_v36  ;;  %v672_v19 = vmax.f32 %v650_v14, %v1423_v13  ;;  %v553_v20 = vadd.f32 %v552_v9, %v551_v37  ;;  %v664_v42 = vadd.f32 %v663_v54, %v1414_v44 }
 0x10f   : > { %v496_v21 = vmax.f32 %v495_v60, %v1419_v59  ;;  %v555_v22 = vmax.f32 %v554_v61, %v546_v55  ;;  %v614_v23 = vmax.f32 %v613_v18, %v605_v17  ;;  %v612_v52 = vadd.f32 %v611_v15, %v610_v47 }
 0x110   : > { %v670_v62 = vrot.slane %v669_v16, 1  ;;  %v673_v53 = vmax.f32 %v672_v19, %v664_v42 }
 0x111   : > { %v497_v24 = vmax.f32 %v496_v21, %v494_v57  ;;  %v556_v25 = vmax.f32 %v555_v22, %v553_v20  ;;  %v615_v43 = vmax.f32 %v614_v23, %v612_v52 }
 0x112   : > { %v671_v7 = vadd.f32 %v670_v62, %v669_v16 }
 0x113   : > { %v498_v26 = vsub.f32 %v473_v45, %v497_v24  ;;  %v501_v27 = vsub.f32 %v480_v10, %v497_v24  ;;  %v504_v28 = vsub.f32 %v1419_v59, %v497_v24  ;;  %v507_v2 = vsub.f32 %v494_v57, %v497_v24  ;;  %v1117_v57 = vpop.f32.mrf.mxu1 }
 0x114   : > { %v557_v29 = vsub.f32 %v532_v58, %v556_v25  ;;  %v560_v0 = vsub.f32 %v539_v11, %v556_v25  ;;  %v563_v32 = vsub.f32 %v546_v55, %v556_v25  ;;  %v566_v54 = vsub.f32 %v553_v20, %v556_v25 }
 0x115   : > { %v499_v3 = vmul.f32 1.442695, %v498_v26  ;;  %v502_v30 = vmul.f32 1.442695, %v501_v27  ;;  %v505_v31 = vmul.f32 1.442695, %v504_v28  ;;  %v674_v33 = vmax.f32 %v673_v53, %v671_v7  ;;  %v452_v62 = vpop.f32.mrf.mxu1 }
 0x116   : > { %v508_v44 = vmul.f32 1.442695, %v507_v2  ;;  %v558_v34 = vmul.f32 1.442695, %v557_v29  ;;  %v616_v35 = vsub.f32 %v591_v63, %v615_v43  ;;  %v619_v36 = vsub.f32 %v598_v12, %v615_v43  ;;  %v320_v2 = vpop.permute.xlu0 %319 }
 0x117   : > { %1175 = vpow2.f32 %v499_v3  ;;  %v561_v37 = vmul.f32 1.442695, %v560_v0  ;;  %v622_v38 = vsub.f32 %v605_v17, %v615_v43  ;;  %v564_v59 = vmul.f32 1.442695, %v563_v32  ;;  %v1118_v28 = vpop.f32.mrf.mxu1  ;;  %v325_v0 = vpop.permute.xlu1 %324 }
 0x118   : > { %1177 = vpow2.f32 %v502_v30  ;;  %v567_v39 = vmul.f32 1.442695, %v566_v54  ;;  %v625_v40 = vsub.f32 %v612_v52, %v615_v43  ;;  %v617_v41 = vmul.f32 1.442695, %v616_v35 }
 0x119   : > { %1179 = vpow2.f32 %v505_v31  ;;  %v620_v45 = vmul.f32 1.442695, %v619_v36  ;;  %v675_v46 = vsub.f32 %v650_v14, %v674_v33  ;;  %v623_v47 = vmul.f32 1.442695, %v622_v38  ;;  %v455_v30 = vpop.f32.mrf.mxu1 }
 0x11a   : > { %1181 = vpow2.f32 %v508_v44  ;;  %v678_v48 = vsub.f32 %v1423_v13, %v674_v33  ;;  %v626_v50 = vmul.f32 1.442695, %v625_v40  ;;  %v681_v51 = vsub.f32 %v664_v42, %v674_v33  ;;  %v330_v44 = vpop.permute.xlu0 %329 }
 0x11b   : > { %1183 = vpow2.f32 %v558_v34  ;;  %v676_v56 = vmul.f32 1.442695, %v675_v46  ;;  %v684_v63 = vsub.f32 %v671_v7, %v674_v33  ;;  %v453_v32 = vadd.f32 %v452_v62, %v320_v2 }
 0x11c   : > { %1185 = vpow2.f32 %v561_v37  ;;  %v679_v58 = vmul.f32 1.442695, %v678_v48  ;;  %v682_v1 = vmul.f32 1.442695, %v681_v51  ;;  %v456_v54 = vadd.f32 %v455_v30, %v325_v0  ;;  %v335_v37 = vpop.permute.xlu1 %334 }
 0x11d   : > { %1187 = vpow2.f32 %v564_v59  ;;  %v685_v10 = vmul.f32 1.442695, %v684_v63  ;;  %v461_v36 = vadd.f32 %v1117_v57, %v330_v44 }
 0x11e   : > { %1189 = vpow2.f32 %v567_v39 }
 0x11f   : > { %1191 = vpow2.f32 %v617_v41  ;;  %v464_v41 = vadd.f32 %v1118_v28, %v335_v37 }
 0x120   : > { %1193 = vpow2.f32 %v620_v45 }
 0x121   : > { %1195 = vpow2.f32 %v623_v47 }
 0x122   : > { %1197 = vpow2.f32 %v626_v50 }
 0x123   : > { %1199 = vpow2.f32 %v676_v56 }
 0x124   : > { %v1176_v9 = vpop.eup %1175  ;;  %1201 = vpow2.f32 %v679_v58 }
 0x125   : > { %v1178_v11 = vpop.eup %1177  ;;  %1203 = vpow2.f32 %v682_v1 }
 0x126   : > { %v1180_v12 = vpop.eup %1179  ;;  %v510_v13 = vadd.f32 %v1178_v11, %v1176_v9  ;;  %1205 = vpow2.f32 %v685_v10 }
 0x127   : > { %v1182_v55 = vpop.eup %1181 }
 0x128   : > { %v1184_v14 = vpop.eup %1183  ;;  %v511_v15 = vadd.f32 %v1180_v12, %v510_v13 }
 0x129   : > { %v1186_v16 = vpop.eup %1185 }
 0x12a   : > { %v1188_v17 = vpop.eup %1187  ;;  %v512_v60 = vadd.f32 %v1182_v55, %v511_v15  ;;  %v569_v61 = vadd.f32 %v1186_v16, %v1184_v14  ;;  %v706_v15 = vpop.permute.xlu0 %705 }
 0x12b   : > { %v1190_v18 = vpop.eup %1189 }
 0x12c   : > { %v1192_v19 = vpop.eup %1191  ;;  %1207 = vrcp.f32 %v512_v60  ;;  %v570_v20 = vadd.f32 %v1188_v17, %v569_v61 }
 0x12d   : > { %v1194_v21 = vpop.eup %1193 }
 0x12e   : > { %v1196_v22 = vpop.eup %1195  ;;  %v571_v23 = vadd.f32 %v1190_v18, %v570_v20  ;;  %v628_v42 = vadd.f32 %v1194_v21, %v1192_v19  ;;  %v716_v44 = vpop.permute.xlu0 %715 }
 0x12f   : > { %v1198_v52 = vpop.eup %1197 }
 0x130   : > { %v1200_v24 = vpop.eup %1199  ;;  %1209 = vrcp.f32 %v571_v23  ;;  %v629_v25 = vadd.f32 %v1196_v22, %v628_v42 }
 0x131   : > { %v1202_v43 = vpop.eup %1201 }
 0x132   : > { %v630_v53 = vadd.f32 %v1198_v52, %v629_v25  ;;  %v687_v26 = vadd.f32 %v1202_v43, %v1200_v24  ;;  %v1204_v27 = vpop.eup %1203 }
 0x133   : > { %v1206_v29 = vpop.eup %1205 }
 0x134   : > { %1211 = vrcp.f32 %v630_v53  ;;  %v688_v7 = vadd.f32 %v1204_v27, %v687_v26  ;;  %v711_v53 = vpop.permute.xlu1 %710 }
 0x136   : > { %v689_v3 = vadd.f32 %v1206_v29, %v688_v7 }
 0x138   : > { %1213 = vrcp.f32 %v689_v3 }
 0x139   : > { %v1208_v31 = vpop.eup %1207 }
 0x13a   : > { %v517_v33 = vmul.f32 %v1208_v31, %v1178_v11  ;;  %v515_v34 = vmul.f32 %v1208_v31, %v1176_v9  ;;  %v520_v35 = vmul.f32 %v1208_v31, %v1180_v12  ;;  %v523_v39 = vmul.f32 %v1208_v31, %v1182_v55 }
 0x13c   : > { %v516_v38 = vmul.f32 %v515_v34, %v453_v32  ;;  %v518_v59 = vmul.f32 %v517_v33, %v456_v54  ;;  %v521_v45 = vmul.f32 %v520_v35, %v461_v36  ;;  %v524_v56 = vmul.f32 %v523_v39, %v464_v41 }
 0x13d   : > { %v1210_v40 = vpop.eup %1209 }
 0x13e   : > { %v576_v46 = vmul.f32 %v1210_v40, %v1186_v16  ;;  %v519_v47 = vadd.f32 %v518_v59, %v516_v38  ;;  %v574_v48 = vmul.f32 %v1210_v40, %v1184_v14  ;;  %v579_v49 = vmul.f32 %v1210_v40, %v1188_v17 }
 0x13f   : > { %v582_v50 = vmul.f32 %v1210_v40, %v1190_v18 }
 0x140   : > { %v522_v51 = vadd.f32 %v521_v45, %v519_v47  ;;  %v575_v58 = vmul.f32 %v574_v48, %v453_v32  ;;  %v577_v63 = vmul.f32 %v576_v46, %v456_v54  ;;  %v580_v9 = vmul.f32 %v579_v49, %v461_v36 }
 0x141   : > { %v1212_v1 = vpop.eup %1211  ;;  %v583_v55 = vmul.f32 %v582_v50, %v464_v41 }
 0x142   : > { %v525_v10 = vadd.f32 %v524_v56, %v522_v51  ;;  %v578_v11 = vadd.f32 %v577_v63, %v575_v58  ;;  %v633_v12 = vmul.f32 %v1212_v1, %v1192_v19  ;;  %v635_v13 = vmul.f32 %v1212_v1, %v1194_v21 }
 0x143   : > { %v638_v60 = vmul.f32 %v1212_v1, %v1196_v22  ;;  %v641_v61 = vmul.f32 %v1212_v1, %v1198_v52 }
 0x144   : > { %v581_v57 = vadd.f32 %v580_v9, %v578_v11  ;;  %v634_v16 = vmul.f32 %v633_v12, %v453_v32  ;;  %v636_v20 = vmul.f32 %v635_v13, %v456_v54  ;;  %v723_v14 = vadd.f32 %v706_v15, %v525_v10 }
 0x145   : > { %v1214_v17 = vpop.eup %1213  ;;  %v639_v18 = vmul.f32 %v638_v60, %v461_v36  ;;  %v642_v26 = vmul.f32 %v641_v61, %v464_v41  ;;  %v779_v60 = vpop.permute.xlu0 %778 }
 0x146   : > { %v584_v23 = vadd.f32 %v583_v55, %v581_v57  ;;  %v637_v42 = vadd.f32 %v636_v20, %v634_v16  ;;  %v692_v62 = vmul.f32 %v1214_v17, %v1200_v24  ;;  %v694_v25 = vmul.f32 %v1214_v17, %v1202_v43 }
 0x147   : > { %v697_v28 = vmul.f32 %v1214_v17, %v1204_v27  ;;  %v700_v2 = vmul.f32 %v1214_v17, %v1206_v29  ;;  %v727_v19 = vadd.f32 %v723_v14, %v1338_v6  ;;  %v721_v29 = vpop.permute.xlu1 %720 }
 0x148   : > { %v640_v21 = vadd.f32 %v639_v18, %v637_v42  ;;  %v693_v7 = vmul.f32 %v692_v62, %v453_v32  ;;  %v695_v22 = vmul.f32 %v694_v25, %v456_v54  ;;  %v724_v52 = vadd.f32 %v711_v53, %v584_v23 }
 0x149   : > { %v698_v30 = vmul.f32 %v697_v28, %v461_v36  ;;  %v701_v34 = vmul.f32 %v700_v2, %v464_v41  ;;  %v803_v57 = vpop.permute.xlu0 %802 }
 0x14a   : > { %v643_v0 = vadd.f32 %v642_v26, %v640_v21  ;;  %v696_v3 = vadd.f32 %v695_v22, %v693_v7  ;;  %v728_v31 = vadd.f32 %v724_v52, %v1343_v8 }
 0x14b   : > { %v784_v55 = vpop.permute.xlu1 %783 }
 0x14c   : > { %v699_v33 = vadd.f32 %v698_v30, %v696_v3  ;;  %v725_v24 = vadd.f32 %v716_v44, %v643_v0  ;;  %v731_v43 = vadd.f32 %v728_v31, %v727_v19  ;;  %v1174_v3 = vld [vmem:[%s1441_s13 + $0x8] sm:$0xff]  }
 0x14d   : > { %v769_v20 = vpop.permute.xlu0 %768 }
 0x14e   : > { %v702_v35 = vadd.f32 %v701_v34, %v699_v33  ;;  %v729_v27 = vadd.f32 %v725_v24, %v1334_v4 }
 0x14f   : > { %v808_v61 = vpop.permute.xlu1 %807 }
 0x150   : > { %v726_v37 = vadd.f32 %v721_v29, %v702_v35  ;;  %v732_v6 = vadd.f32 %v731_v43, %v729_v27 }
 0x151   : > { %v793_v2 = vpop.permute.xlu0 %792 }
 0x152   : > { %v730_v32 = vadd.f32 %v726_v37, %v1336_v5 }
 0x153   : > { %v774_v16 = vpop.permute.xlu1 %773 }
 0x154   : > { %v733_v54 = vadd.f32 %v732_v6, %v730_v32 }
 0x155   : > { %v819_v30 = vpop.permute.xlu0 %818 }
 0x156   : > { %v734_v38 = vrot.slane %v733_v54, 4 }
 0x157   : > { %v798_v28 = vpop.permute.xlu1 %797 }
 0x158   : > { %v735_v59 = vadd.f32 %v734_v38, %v733_v54 }
 0x159   : > { %v829_v43 = vpop.permute.xlu0 %828 }
 0x15a   : > { %v736_v39 = vrot.slane %v735_v59, 2 }
 0x15b   : > { %v824_v44 = vpop.permute.xlu1 %823 }
 0x15c   : > { %v737_v36 = vadd.f32 %v736_v39, %v735_v59 }
 0x15e   : > { %v738_v40 = vrot.slane %v737_v36, 1 }
 0x15f   : > { %v834_v37 = vpop.permute.xlu1 %833 }
 0x160   : > { %v739_v8 = vadd.f32 %v738_v40, %v737_v36 }
 0x162   : > { %v741_v45 = vmul.f32 0.03125, %v739_v8 }
 0x164   : > { %v742_v46 = vsub.f32 %v727_v19, %v741_v45  ;;  %v743_v41 = vsub.f32 %v728_v31, %v741_v45  ;;  %v744_v47 = vsub.f32 %v729_v27, %v741_v45  ;;  %v745_v48 = vsub.f32 %v730_v32, %v741_v45 }
 0x166   : > { %v746_v49 = vmul.f32 %v742_v46, %v742_v46  ;;  %v747_v50 = vmul.f32 %v743_v41, %v743_v41  ;;  %v748_v4 = vmul.f32 %v744_v47, %v744_v47  ;;  %v749_v56 = vmul.f32 %v745_v48, %v745_v48 }
 0x168   : > { %v750_v51 = vadd.f32 %v747_v50, %v746_v49 }
 0x16a   : > { %v751_v58 = vadd.f32 %v750_v51, %v748_v4 }
 0x16c   : > { %v752_v63 = vadd.f32 %v751_v58, %v749_v56 }
 0x16e   : > { %v753_v5 = vrot.slane %v752_v63, 4 }
 0x170   : > { %v754_v1 = vadd.f32 %v753_v5, %v752_v63 }
 0x172   : > { %v755_v9 = vrot.slane %v754_v1, 2 }
 0x174   : > { %v756_v10 = vadd.f32 %v755_v9, %v754_v1 }
 0x176   : > { %v757_v11 = vrot.slane %v756_v10, 1 }
 0x178   : > { %v758_v12 = vadd.f32 %v757_v11, %v756_v10 }
 0x17a   : > { %v759_v13 = vmul.f32 0.03125, %v758_v12 }
 0x17c   : > { %v760_v15 = vadd.f32 1e-05, %v759_v13 }
 0x17e   : > { %1215 = vrsqrt.f32 %v760_v15 }
 0x18b   : > { %v1216_v14 = vpop.eup %1215 }
 0x18c   : > { %v764_v17 = vmul.f32 %v1216_v14, %v744_v47  ;;  %v765_v18 = vmul.f32 %v1216_v14, %v745_v48  ;;  %v762_v23 = vmul.f32 %v1216_v14, %v742_v46  ;;  %v763_v42 = vmul.f32 %v1216_v14, %v743_v41  ;;  %v942_v14 = vpop.permute.xlu0 %941 }
 0x18e   : > { %v788_v62 = vmul.f32 %v779_v60, %v764_v17  ;;  %v789_v25 = vmul.f32 %v784_v55, %v765_v18  ;;  %v786_v53 = vmul.f32 %v769_v20, %v762_v23  ;;  %v787_v26 = vmul.f32 %v774_v16, %v763_v42  ;;  %v947_v20 = vpop.permute.xlu1 %946 }
 0x190   : > { %v812_v19 = vadd.f32 %v803_v57, %v788_v62  ;;  %v813_v21 = vadd.f32 %v808_v61, %v789_v25  ;;  %v810_v7 = vadd.f32 %v793_v2, %v786_v53  ;;  %v811_v22 = vadd.f32 %v798_v28, %v787_v26  ;;  %v952_v18 = vpop.permute.xlu0 %951 }
 0x192   : > { %v815_v52 = vpack.c.bf16 %v813_v21, %v812_v19  ;;  %v814_v0 = vpack.c.bf16 %v811_v22, %v810_v7  ;;  %v957_v17 = vpop.permute.xlu1 %956 }
 0x194   : > { %1119 = vmatprep.subr.bf16.mxu1 %v815_v52  ;;  %v966_v42 = vpop.permute.xlu0 %965 }
 0x195   : > { %1120 = vmatpush3.bf16.msra.mxu1 %v815_v52 }
 0x196   : > { %1121 = vmatprep.subr.bf16.mxu1 %v814_v0  ;;  %v971_v23 = vpop.permute.xlu1 %970 }
 0x198   : > { %v976_v52 = vpop.permute.xlu0 %975 }
 0x199   : > { %1122 = vmatpush3.bf16.msra.mxu1 %v814_v0 }
 0x19c   : > { %1124 = vmatmul.mubr.msk.bf16.vlgmr.msra.gmra.mxu1 %vm367_vm0, %v1174_v3 }
 0x25c   : > { %v1125_v31 = vpop.f32.mrf.mxu1 }
 0x25d   : > { %v895_v27 = vadd.f32 %v1125_v31, %v829_v43 }
 0x25e   : > { %v886_v33 = vpop.f32.mrf.mxu1 }
 0x25f   : > { %v887_v24 = vadd.f32 %v886_v33, %v819_v30  ;;  %v903_v38 = vadd.f32 %v895_v27, %v812_v19 }
 0x260   : > { %v1126_v34 = vpop.f32.mrf.mxu1 }
 0x261   : > { %v901_v6 = vadd.f32 %v887_v24, %v810_v7  ;;  %v898_v32 = vadd.f32 %v1126_v34, %v834_v37 }
 0x262   : > { %v889_v35 = vpop.f32.mrf.mxu1 }
 0x263   : > { %v890_v29 = vadd.f32 %v889_v35, %v824_v44  ;;  %v904_v39 = vadd.f32 %v898_v32, %v813_v21 }
 0x265   : > { %v902_v54 = vadd.f32 %v890_v29, %v811_v22  ;;  %v981_v22 = vpop.permute.xlu1 %980 }
 0x267   : > { %v905_v59 = vadd.f32 %v902_v54, %v901_v6 }
 0x269   : > { %v906_v36 = vadd.f32 %v905_v59, %v903_v38 }
 0x26b   : > { %v907_v40 = vadd.f32 %v906_v36, %v904_v39 }
 0x26d   : > { %v908_v8 = vrot.slane %v907_v40, 4 }
 0x26f   : > { %v909_v45 = vadd.f32 %v908_v8, %v907_v40 }
 0x271   : > { %v910_v46 = vrot.slane %v909_v45, 2 }
 0x273   : > { %v911_v41 = vadd.f32 %v910_v46, %v909_v45 }
 0x275   : > { %v912_v47 = vrot.slane %v911_v41, 1 }
 0x277   : > { %v913_v48 = vadd.f32 %v912_v47, %v911_v41 }
 0x279   : > { %v914_v49 = vmul.f32 0.03125, %v913_v48 }
 0x27b   : > { %v915_v50 = vsub.f32 %v901_v6, %v914_v49  ;;  %v916_v4 = vsub.f32 %v902_v54, %v914_v49  ;;  %v917_v51 = vsub.f32 %v903_v38, %v914_v49  ;;  %v918_v56 = vsub.f32 %v904_v39, %v914_v49 }
 0x27d   : > { %v919_v58 = vmul.f32 %v915_v50, %v915_v50  ;;  %v920_v63 = vmul.f32 %v916_v4, %v916_v4  ;;  %v921_v5 = vmul.f32 %v917_v51, %v917_v51  ;;  %v922_v9 = vmul.f32 %v918_v56, %v918_v56 }
 0x27f   : > { %v923_v1 = vadd.f32 %v920_v63, %v919_v58 }
 0x281   : > { %v924_v10 = vadd.f32 %v923_v1, %v921_v5 }
 0x283   : > { %v925_v11 = vadd.f32 %v924_v10, %v922_v9 }
 0x285   : > { %v926_v12 = vrot.slane %v925_v11, 4 }
 0x287   : > { %v927_v13 = vadd.f32 %v926_v12, %v925_v11 }
 0x289   : > { %v928_v15 = vrot.slane %v927_v13, 2 }
 0x28b   : > { %v929_v55 = vadd.f32 %v928_v15, %v927_v13 }
 0x28d   : > { %v930_v60 = vrot.slane %v929_v55, 1 }
 0x28f   : > { %v931_v61 = vadd.f32 %v930_v60, %v929_v55 }
 0x291   : > { %v932_v57 = vmul.f32 0.03125, %v931_v61 }
 0x293   : > { %v933_v16 = vadd.f32 1e-05, %v932_v57 }
 0x295   : > { %1217 = vrsqrt.f32 %v933_v16 }
 0x2a2   : > { %v1218_v62 = vpop.eup %1217 }
 0x2a3   : > { %v935_v25 = vmul.f32 %v1218_v62, %v915_v50  ;;  %v936_v53 = vmul.f32 %v1218_v62, %v916_v4  ;;  %v937_v26 = vmul.f32 %v1218_v62, %v917_v51  ;;  %v938_v28 = vmul.f32 %v1218_v62, %v918_v56 }
 0x2a5   : > { %v959_v2 = vmul.f32 %v942_v14, %v935_v25  ;;  %v960_v19 = vmul.f32 %v947_v20, %v936_v53  ;;  %v961_v21 = vmul.f32 %v952_v18, %v937_v26  ;;  %v962_v7 = vmul.f32 %v957_v17, %v938_v28 }
 0x2a7   : > { %v984_v0 = vadd.f32 %v971_v23, %v960_v19  ;;  %v983_v3 = vadd.f32 %v966_v42, %v959_v2  ;;  %v985_v30 = vadd.f32 %v976_v52, %v961_v21  ;;  %v986_v31 = vadd.f32 %v981_v22, %v962_v7 }
 0x2a9   : > { %988 = vst [vmem:[#allocation2 + $0x8] sm:$0xff] %v984_v0  ;;  %987 = vst [vmem:[#allocation2] sm:$0xff] %v983_v3 }
 0x2aa   : > { %989 = vst [vmem:[#allocation2 + $0x10] sm:$0xff] %v985_v30  ;;  %990 = vst [vmem:[#allocation2 + $0x18] sm:$0xff] %v986_v31 }
 0x2ab   : > { %1232 = shalt.err (!%p1229_p12)
}
 0x2ac   : > { %s1273_s18 = smov 128   ;;  %s1274_s22 = smov 8  }
 0x2ad   : > { %1132 = dma.vmem_to_hbm [thread:$0]  (%p1454_p5), %s1000_s15, 512, %s1482_s4, [#allocation3], %s1273_s18, %s1273_s18, %s1274_s22  }
 0x2ae   : > { %1256 = dma.done.wait (%p1454_p5), [#allocation3], 512  }
 0x2af   : > { %1258 = vsyncadd (%p1454_p5), [#allocation3], 4294966784 }
 0x2b0 PF: > { %s15_s17 = sadd.s32 1, %s1269_s17   ;;  %s1484_s15 = smov %s1265_s16 }
 0x2b1   : > { %p12_p13 = scmp.ge.s32.totalorder %s15_s17, 4   ;;  %s1485_s16 = smov %s1487_s19 }
 0x2b3   :  { %14 = sbr.rel (!%p12_p13) target bundleno = 2 (0x2), region = 71 }
 0x2b8   :  { %1015 = vsyncpa [#allocation3], 1 }
 0x2b9   :  { %1017 = vsyncpa [#allocation3 + $0x1], 1 }

</bundles_post_ra>
